<compile_context>
chip_gen: v7x
topology: tpu7x:2x2x1
jax: 0.10.0
libtpu: 0.0.40
codegen_flags: <defaults>
</compile_context>

<pallas_src>
import functools
from collections import namedtuple

import jax
import jax.numpy as jnp
from jax.experimental import pallas as pl
from jax.experimental.pallas import tpu as pltpu


PackedParams = namedtuple(
    "PackedParams",
    ["body_flat", "w_head", "b_head", "obs_dim", "hidden_dim",
     "action_dim", "a_pad", "n_body", "mxu_dtype"])


def _round_up(x, m):
    return ((x + m - 1) // m) * m


def _gaussian_mlp_kernel(*refs, n_body, action_dim, max_action,
                         min_variance, max_variance, mxu_dtype):
    """refs = (x, w0, b0, ..., w_{n-1}, b_{n-1}, w_head, b_head, out)."""
    x_ref = refs[0]
    param_refs = refs[1:1 + 2 * n_body + 2]
    out_ref = refs[-1]

    h = x_ref[...]                                           # (tb, obs), mxu dtype
    # Body: Linear + tanh for every layer (the last tanh is the explicit
    # torch.tanh(self.body(x)) in the PyTorch forward).
    for layer in range(n_body):
        w = param_refs[2 * layer][...]                       # (din, dout), mxu dtype
        b = param_refs[2 * layer + 1][...]                   # (1, dout), f32
        z = jnp.dot(h, w, preferred_element_type=jnp.float32) + b
        h = jnp.tanh(z).astype(mxu_dtype)

    # Fused heads: one matmul, lanes [0:A] = mean pre-act, [A:2A] = var pre-act,
    # remaining padded lanes are zero-weighted (sliced off in the wrapper).
    w_h = param_refs[2 * n_body][...]                        # (hidden, a_pad)
    b_h = param_refs[2 * n_body + 1][...]                    # (1, a_pad), f32
    z = jnp.dot(h, w_h, preferred_element_type=jnp.float32) + b_h

    mean = jnp.tanh(z) * max_action
    softplus = jnp.maximum(z, 0.0) + jnp.log1p(jnp.exp(-jnp.abs(z)))
    var = jnp.clip(softplus, min_variance, max_variance)

    lane = jax.lax.broadcasted_iota(jnp.int32, z.shape, dimension=1)
    out_ref[...] = jnp.where(lane < action_dim, mean, var)


def pack_gaussian_mlp_params(body_params, mean_params, var_params, *,
                             mxu_dtype=jnp.float32):
    """One-time parameter packing (do NOT call per forward step).

    body_params: list of (W (din, dout), b bias) for the body layers.
    mean_params / var_params: (W (hidden, action), b bias).
    """
    n_body = len(body_params)
    obs_dim = body_params[0][0].shape[0]
    hidden_dim = body_params[-1][0].shape[1]
    action_dim = mean_params[0].shape[1]
    assert mean_params[0].shape == (hidden_dim, action_dim)
    assert var_params[0].shape == (hidden_dim, action_dim)

    body_flat = []
    for w, b in body_params:
        body_flat.append(jnp.asarray(w, jnp.float32).astype(mxu_dtype))
        body_flat.append(jnp.asarray(b, jnp.float32).reshape(1, -1))

    # Single lane-dense head slab (multiple of 128 lanes -> unmasked vst).
    a_pad = max(128, _round_up(2 * action_dim, 128))
    w_m = jnp.asarray(mean_params[0], jnp.float32)
    w_v = jnp.asarray(var_params[0], jnp.float32)
    b_m = jnp.asarray(mean_params[1], jnp.float32).reshape(1, -1)
    b_v = jnp.asarray(var_params[1], jnp.float32).reshape(1, -1)
    w_head = jnp.zeros((hidden_dim, a_pad), jnp.float32)
    w_head = w_head.at[:, :action_dim].set(w_m)
    w_head = w_head.at[:, action_dim:2 * action_dim].set(w_v)
    b_head = jnp.zeros((1, a_pad), jnp.float32)
    b_head = b_head.at[:, :action_dim].set(b_m)
    b_head = b_head.at[:, action_dim:2 * action_dim].set(b_v)

    return PackedParams(tuple(body_flat), w_head.astype(mxu_dtype), b_head,
                        obs_dim, hidden_dim, action_dim, a_pad, n_body,
                        mxu_dtype)


def _pick_block_bs(bs, obs_dim, a_pad, x_itemsize, param_bytes, max_width,
                   vmem_budget=None, max_rows=2048):
    """Largest batch tile that fits a conservative scoped-VMEM budget.

    No forced grid split for small batches (per-grid-step overhead ~0.35 us
    and tile sweeps favour 512+ row tiles); large batches split naturally at
    the VMEM-derived cap, which is also when v7x megacore sharding pays off.
    """
    if vmem_budget is None:
        vmem_budget = 16 << 20  # <= default scoped limit on every generation
        try:
            cap = int(pltpu.get_tpu_info().vmem_capacity_bytes)  # 64 MiB on v7x
            vmem_budget = min(vmem_budget, cap // 8)
        except Exception:
            pass
    # Double-buffered x/out tiles + headroom for live f32 intermediates.
    per_row = 2 * (obs_dim * x_itemsize + a_pad * 4) + 6 * max_width * 4
    cap_rows = (vmem_budget - param_bytes) // per_row
    cap_rows = int(max(8, min(cap_rows, max_rows)))
    if bs <= cap_rows:
        return bs                      # single grid step, full-array batch block
    return max(8, (cap_rows // 8) * 8)


def gaussian_mlp_forward(x, packed, *, max_action, min_variance, max_variance,
                         block_bs=None):
    """Pallas implementation of GaussianMlp.forward. Returns (mean, var)."""
    bs = x.shape[0]
    assert x.shape == (bs, packed.obs_dim), (x.shape, packed.obs_dim)
    x = jnp.asarray(x, jnp.float32).astype(packed.mxu_dtype)

    all_params = list(packed.body_flat) + [packed.w_head, packed.b_head]
    param_bytes = sum(int(a.size) * a.dtype.itemsize for a in all_params)
    max_width = max([packed.a_pad, packed.obs_dim]
                    + [w.shape[1] for w in packed.body_flat[0::2]])

    if block_bs is None:
        block_bs = _pick_block_bs(bs, packed.obs_dim, packed.a_pad,
                                  x.dtype.itemsize, param_bytes, max_width)

    n_blocks = (bs + block_bs - 1) // block_bs
    bs_pad = n_blocks * block_bs
    if bs_pad != bs:
        x = jnp.pad(x, ((0, bs_pad - bs), (0, 0)))

    def full_spec(arr):
        # Constant-index full-array block: DMA'd once, resident in VMEM for all
        # grid steps.  (Default double-buffering only wastes ~tens of KB here,
        # so we keep the simple default rather than pl.Buffered(1).)
        return pl.BlockSpec(arr.shape, lambda i: (0,) * arr.ndim)

    in_specs = [pl.BlockSpec((block_bs, packed.obs_dim), lambda i: (i, 0))]
    in_specs += [full_spec(a) for a in all_params]
    out_specs = pl.BlockSpec((block_bs, packed.a_pad), lambda i: (i, 0))
    out_shape = jax.ShapeDtypeStruct((bs_pad, packed.a_pad), jnp.float32)

    kernel = functools.partial(
        _gaussian_mlp_kernel,
        n_body=packed.n_body,
        action_dim=packed.action_dim,
        max_action=float(max_action),
        min_variance=float(min_variance),
        max_variance=float(max_variance),
        mxu_dtype=packed.mxu_dtype)

    out = pl.pallas_call(
        kernel,
        out_shape=out_shape,
        grid_spec=pltpu.PrefetchScalarGridSpec(
            num_scalar_prefetch=0,
            grid=(n_blocks,),
            in_specs=in_specs,
            out_specs=out_specs),
        compiler_params=pltpu.CompilerParams(
            dimension_semantics=("parallel",)),
    )(x, *all_params)

    # Single packed slab -> one narrow read-back covering both heads.
    heads = out[:bs, :2 * packed.action_dim]
    return heads[:, :packed.action_dim], heads[:, packed.action_dim:]


def _reference(x, body_params, mean_params, var_params, *,
               max_action, min_variance, max_variance):
    """Pure-JAX mirror of the PyTorch GaussianMlp.forward (f32)."""
    h = x
    for w, b in body_params:
        h = jnp.tanh(h @ w + b)
    mean = jnp.tanh(h @ mean_params[0] + mean_params[1]) * max_action
    var = jax.nn.softplus(h @ var_params[0] + var_params[1])
    var = jnp.clip(var, min_variance, max_variance)
    return mean, var


def _init_linear(key, din, dout):
    """torch.nn.Linear-style uniform init, bias stored as (1, dout)."""
    kw, kb = jax.random.split(key)
    bound = float(din) ** -0.5
    w = jax.random.uniform(kw, (din, dout), jnp.float32, -bound, bound)
    b = jax.random.uniform(kb, (1, dout), jnp.float32, -bound, bound)
    return w, b


if __name__ == "__main__":
    OBS_DIM = 16
    HIDDEN_SIZES = [32, 32]
    ACTION_DIM = 4
    MAX_ACTION = 2.0
    MIN_VARIANCE = 1e-3
    MAX_VARIANCE = 5.0
    BS = 16

    key = jax.random.PRNGKey(0)
    keys = jax.random.split(key, len(HIDDEN_SIZES) + 4)

    layer_sizes = [OBS_DIM] + HIDDEN_SIZES
    body_params = [_init_linear(keys[i], layer_sizes[i], layer_sizes[i + 1])
                   for i in range(len(layer_sizes) - 1)]
    mean_params = _init_linear(keys[-4], layer_sizes[-1], ACTION_DIM)
    var_params = _init_linear(keys[-3], layer_sizes[-1], ACTION_DIM)
    x = jax.random.normal(keys[-2], (BS, OBS_DIM), jnp.float32)

    hp = dict(max_action=MAX_ACTION, min_variance=MIN_VARIANCE,
              max_variance=MAX_VARIANCE)
    ref_mean, ref_var = _reference(x, body_params, mean_params, var_params, **hp)

    # --- f32 MXU path: bit-faithful to the PyTorch module, single grid step. ---
    packed_f32 = pack_gaussian_mlp_params(
        body_params, mean_params, var_params, mxu_dtype=jnp.float32)
    mean, var = gaussian_mlp_forward(x, packed_f32, **hp)
    mean, var = jax.block_until_ready((mean, var))
    assert mean.shape == (BS, ACTION_DIM) and var.shape == (BS, ACTION_DIM)
    assert jnp.allclose(mean, ref_mean, atol=2e-3, rtol=2e-3), "mean mismatch (f32)"
    assert jnp.allclose(var, ref_var, atol=2e-3, rtol=2e-3), "var mismatch (f32)"
    assert bool(jnp.all(var >= MIN_VARIANCE - 1e-6))
    assert bool(jnp.all(var <= MAX_VARIANCE + 1e-6))
    assert bool(jnp.all(jnp.abs(mean) <= MAX_ACTION + 1e-5))

    # --- bf16 MXU-input path (v6e/v7x lever: single-pass MXU, half input DMA). ---
    packed_bf16 = pack_gaussian_mlp_params(
        body_params, mean_params, var_params, mxu_dtype=jnp.bfloat16)
    mean16, var16 = gaussian_mlp_forward(x, packed_bf16, **hp)
    mean16, var16 = jax.block_until_ready((mean16, var16))
    assert jnp.allclose(mean16, ref_mean, atol=5e-2, rtol=5e-2), "mean mismatch (bf16)"
    assert jnp.allclose(var16, ref_var, atol=5e-2, rtol=5e-2), "var mismatch (bf16)"

    # --- multi-block + batch-padding path (forced small tile, bs % tile != 0). ---
    x2 = jax.random.normal(keys[-1], (20, OBS_DIM), jnp.float32)
    ref_mean2, ref_var2 = _reference(x2, body_params, mean_params, var_params, **hp)
    mean2, var2 = gaussian_mlp_forward(x2, packed_f32, block_bs=8, **hp)
    mean2, var2 = jax.block_until_ready((mean2, var2))
    assert mean2.shape == (20, ACTION_DIM) and var2.shape == (20, ACTION_DIM)
    assert jnp.allclose(mean2, ref_mean2, atol=2e-3, rtol=2e-3), "mean mismatch (multiblock)"
    assert jnp.allclose(var2, ref_var2, atol=2e-3, rtol=2e-3), "var mismatch (multiblock)"

    print("KERNEL_OK")
</pallas_src>

<mosaic_0001>
module attributes {stable_mosaic.version = 11 : i64} {
  func.func @_gaussian_mlp_kernel(%arg0: i32, %arg1: memref<16x16xf32, #tpu.memory_space<vmem>>, %arg2: memref<16x32xf32, #tpu.memory_space<vmem>>, %arg3: memref<1x32xf32, #tpu.memory_space<vmem>>, %arg4: memref<32x32xf32, #tpu.memory_space<vmem>>, %arg5: memref<1x32xf32, #tpu.memory_space<vmem>>, %arg6: memref<32x128xf32, #tpu.memory_space<vmem>>, %arg7: memref<1x128xf32, #tpu.memory_space<vmem>>, %arg8: memref<16x128xf32, #tpu.memory_space<vmem>>) attributes {dimension_semantics = [#tpu.dimension_semantics<parallel>], iteration_bounds = array<i64: 1>, scalar_prefetch = 0 : i64, scratch_operands = 0 : i64, tpu.core_type = #tpu.core_type<tc>, window_params = [{transform_indices = @transform_0, window_bounds = array<i64: 16, 16>}, {pipeline_mode = #tpu.pipeline_mode<synchronous>, transform_indices = @transform_1, window_bounds = array<i64: 16, 32>}, {pipeline_mode = #tpu.pipeline_mode<synchronous>, transform_indices = @transform_2, window_bounds = array<i64: 1, 32>}, {pipeline_mode = #tpu.pipeline_mode<synchronous>, transform_indices = @transform_3, window_bounds = array<i64: 32, 32>}, {pipeline_mode = #tpu.pipeline_mode<synchronous>, transform_indices = @transform_4, window_bounds = array<i64: 1, 32>}, {pipeline_mode = #tpu.pipeline_mode<synchronous>, transform_indices = @transform_5, window_bounds = array<i64: 32, 128>}, {pipeline_mode = #tpu.pipeline_mode<synchronous>, transform_indices = @transform_6, window_bounds = array<i64: 1, 128>}, {transform_indices = @transform_7, window_bounds = array<i64: 16, 128>}]} {
    %c0 = arith.constant 0 : index
    %c0_0 = arith.constant 0 : index
    %0 = vector.load %arg1[%c0, %c0_0] : memref<16x16xf32, #tpu.memory_space<vmem>>, vector<16x16xf32>
    %c0_1 = arith.constant 0 : index
    %c0_2 = arith.constant 0 : index
    %1 = vector.load %arg2[%c0_1, %c0_2] : memref<16x32xf32, #tpu.memory_space<vmem>>, vector<16x32xf32>
    %c0_3 = arith.constant 0 : index
    %c0_4 = arith.constant 0 : index
    %2 = vector.load %arg3[%c0_3, %c0_4] : memref<1x32xf32, #tpu.memory_space<vmem>>, vector<1x32xf32>
    %cst = arith.constant dense<0.000000e+00> : vector<16x32xf32>
    %3 = tpu.matmul %0, %1, %cst {dimension_numbers = #tpu.dot_dimension_numbers<[1], [0], [0], [1], [0, 0, 1, 1], [], []>} : vector<16x16xf32>, vector<16x32xf32>, vector<16x32xf32> -> vector<16x32xf32>
    %4 = vector.broadcast %2 : vector<1x32xf32> to vector<16x32xf32>
    %5 = arith.addf %3, %4 : vector<16x32xf32>
    %6 = math.tanh %5 : vector<16x32xf32>
    %c0_5 = arith.constant 0 : index
    %c0_6 = arith.constant 0 : index
    %7 = vector.load %arg4[%c0_5, %c0_6] : memref<32x32xf32, #tpu.memory_space<vmem>>, vector<32x32xf32>
    %c0_7 = arith.constant 0 : index
    %c0_8 = arith.constant 0 : index
    %8 = vector.load %arg5[%c0_7, %c0_8] : memref<1x32xf32, #tpu.memory_space<vmem>>, vector<1x32xf32>
    %cst_9 = arith.constant dense<0.000000e+00> : vector<16x32xf32>
    %9 = tpu.matmul %6, %7, %cst_9 {dimension_numbers = #tpu.dot_dimension_numbers<[1], [0], [0], [1], [0, 0, 1, 1], [], []>} : vector<16x32xf32>, vector<32x32xf32>, vector<16x32xf32> -> vector<16x32xf32>
    %10 = vector.broadcast %8 : vector<1x32xf32> to vector<16x32xf32>
    %11 = arith.addf %9, %10 : vector<16x32xf32>
    %12 = math.tanh %11 : vector<16x32xf32>
    %c0_10 = arith.constant 0 : index
    %c0_11 = arith.constant 0 : index
    %13 = vector.load %arg6[%c0_10, %c0_11] : memref<32x128xf32, #tpu.memory_space<vmem>>, vector<32x128xf32>
    %c0_12 = arith.constant 0 : index
    %c0_13 = arith.constant 0 : index
    %14 = vector.load %arg7[%c0_12, %c0_13] : memref<1x128xf32, #tpu.memory_space<vmem>>, vector<1x128xf32>
    %cst_14 = arith.constant dense<0.000000e+00> : vector<16x128xf32>
    %15 = tpu.matmul %12, %13, %cst_14 {dimension_numbers = #tpu.dot_dimension_numbers<[1], [0], [0], [1], [0, 0, 1, 1], [], []>} : vector<16x32xf32>, vector<32x128xf32>, vector<16x128xf32> -> vector<16x128xf32>
    %16 = vector.broadcast %14 : vector<1x128xf32> to vector<16x128xf32>
    %17 = arith.addf %15, %16 : vector<16x128xf32>
    %18 = math.tanh %17 : vector<16x128xf32>
    %cst_15 = arith.constant 2.000000e+00 : f32
    %19 = vector.broadcast %cst_15 : f32 to vector<16x128xf32>
    %20 = arith.mulf %18, %19 : vector<16x128xf32>
    %cst_16 = arith.constant 0.000000e+00 : f32
    %21 = vector.broadcast %cst_16 : f32 to vector<16x128xf32>
    %22 = arith.maximumf %17, %21 : vector<16x128xf32>
    %23 = math.absf %17 : vector<16x128xf32>
    %cst_17 = arith.constant 0.000000e+00 : f32
    %24 = vector.broadcast %cst_17 : f32 to vector<16x128xf32>
    %25 = arith.subf %24, %23 : vector<16x128xf32>
    %26 = math.exp %25 : vector<16x128xf32>
    %27 = math.log1p %26 : vector<16x128xf32>
    %28 = arith.addf %22, %27 : vector<16x128xf32>
    %cst_18 = arith.constant 1.000000e-03 : f32
    %cst_19 = arith.constant 5.000000e+00 : f32
    %29 = vector.broadcast %cst_18 : f32 to vector<16x128xf32>
    %30 = arith.maximumf %29, %28 : vector<16x128xf32>
    %31 = vector.broadcast %cst_19 : f32 to vector<16x128xf32>
    %32 = arith.minimumf %31, %30 : vector<16x128xf32>
    %33 = tpu.iota {dimensions = array<i32: 1>} : vector<16x128xi32>
    %c4_i32 = arith.constant 4 : i32
    %34 = vector.broadcast %c4_i32 : i32 to vector<16x128xi32>
    %35 = arith.cmpi slt, %33, %34 : vector<16x128xi32>
    %36 = arith.select %35, %20, %32 : vector<16x128xi1>, vector<16x128xf32>
    %c0_20 = arith.constant 0 : index
    %c0_21 = arith.constant 0 : index
    %37 = vector.load %arg8[%c0_20, %c0_21] : memref<16x128xf32, #tpu.memory_space<vmem>>, vector<16x128xf32>
    tpu.vector_store %arg8[%c0_20, %c0_21], %36 {strides = array<i32>} : memref<16x128xf32, #tpu.memory_space<vmem>>, vector<16x128xf32>,
    return
  }
  func.func @transform_0(%arg0: i32) -> (i32, i32) {
    %c0_i32 = arith.constant 0 : i32
    %c0_i32_0 = arith.constant 0 : i32
    return %arg0, %c0_i32 : i32, i32
  }
  func.func @transform_1(%arg0: i32) -> (i32, i32) {
    %c0_i32 = arith.constant 0 : i32
    %c0_i32_0 = arith.constant 0 : i32
    %c0_i32_1 = arith.constant 0 : i32
    return %c0_i32, %c0_i32_0 : i32, i32
  }
  func.func @transform_2(%arg0: i32) -> (i32, i32) {
    %c0_i32 = arith.constant 0 : i32
    %c0_i32_0 = arith.constant 0 : i32
    %c0_i32_1 = arith.constant 0 : i32
    return %c0_i32, %c0_i32_0 : i32, i32
  }
  func.func @transform_3(%arg0: i32) -> (i32, i32) {
    %c0_i32 = arith.constant 0 : i32
    %c0_i32_0 = arith.constant 0 : i32
    %c0_i32_1 = arith.constant 0 : i32
    return %c0_i32, %c0_i32_0 : i32, i32
  }
  func.func @transform_4(%arg0: i32) -> (i32, i32) {
    %c0_i32 = arith.constant 0 : i32
    %c0_i32_0 = arith.constant 0 : i32
    %c0_i32_1 = arith.constant 0 : i32
    return %c0_i32, %c0_i32_0 : i32, i32
  }
  func.func @transform_5(%arg0: i32) -> (i32, i32) {
    %c0_i32 = arith.constant 0 : i32
    %c0_i32_0 = arith.constant 0 : i32
    %c0_i32_1 = arith.constant 0 : i32
    return %c0_i32, %c0_i32_0 : i32, i32
  }
  func.func @transform_6(%arg0: i32) -> (i32, i32) {
    %c0_i32 = arith.constant 0 : i32
    %c0_i32_0 = arith.constant 0 : i32
    %c0_i32_1 = arith.constant 0 : i32
    return %c0_i32, %c0_i32_0 : i32, i32
  }
  func.func @transform_7(%arg0: i32) -> (i32, i32) {
    %c0_i32 = arith.constant 0 : i32
    %c0_i32_0 = arith.constant 0 : i32
    return %arg0, %c0_i32 : i32, i32
  }
}

</mosaic_0001>

<bundles_post_ra>
// kernel: tpu_custom_call.1
= control target key start
LH: loop header
LB: loop body
LE: loop exit
PB: predicated region body
PF: predicated region fallthrough
CT: control target
= control target key end

     0   :  { %12 = vsyncpa [#allocation3], 0  ;;  %s796_s0 = inlined_call_operand.hbm [shape: f32[16,16], index: 0, kind: input, shape index: {}]   ;;  %s797_s1 = inlined_call_operand.hbm [shape: f32[16,32], index: 1, kind: input, shape index: {}]   ;;  %s798_s2 = inlined_call_operand.vmem [shape: f32[1,32], index: 2, kind: input, shape index: {}]   ;;  %s799_s3 = inlined_call_operand.hbm [shape: f32[32,32], index: 3, kind: input, shape index: {}]   ;;  %s800_s4 = inlined_call_operand.vmem [shape: f32[1,32], index: 4, kind: input, shape index: {}]   ;;  %s801_s5 = inlined_call_operand.hbm [shape: f32[32,128], index: 5, kind: input, shape index: {}]   ;;  %s802_s6 = inlined_call_operand.vmem [shape: f32[1,128], index: 6, kind: input, shape index: {}]   ;;  %s803_s7 = inlined_call_operand.hbm [shape: f32[16,128], index: 7, kind: output, shape index: {}]  }
   0x1   :  { %13 = vsyncpa [#allocation6], 0 }
   0x2   :  { %14 = vsyncpa [#allocation9], 0 }
   0x3   :  { %15 = vsyncpa [#allocation4], 0  ;;  %s647_s24 = smov [#allocation5]   ;;  %s648_s26 = smov [#allocation2]  }
   0x4   :  { %s33_s25 = sshll.u32 %s647_s24, 4  ;;  %s21_s27 = sshll.u32 %s648_s26, 4  ;;  %s34_s25 = int_to_ptr.vmem [resolvable:$true] %s33_s25  ;;  %s694_s27 = int_to_ptr.vmem [resolvable:$true] %s21_s27 }
   0x5   :  { %s529_s30 = scalar_lea.hbm %s797_s1, 256 }
   0x6   :  { %p530_p0 = scmp.ne.s32.totalorder %s797_s1, %s529_s30  ;;  %p533_p1 = scmp.lt.u32.totalorder %s529_s30, %s797_s1 }
   0x8   :  { %p535_p2 = pnand %p533_p1, %p530_p0 }
   0xa   :  { %538 = shalt.err (!%p535_p2)
}
   0xb   :  { %s539_s12 = scalar_lea.vmem %s34_s25, 256  ;;  %p544_p4 = scmp.lt.s32.totalorder %s34_s25, %s34_s25 }
   0xc   :  { %p540_p3 = scmp.ne.s32.totalorder %s34_s25, %s539_s12  ;;  %p545_p5 = scmp.lt.s32.totalorder %s539_s12, %s539_s12 }
   0xe   :  { %p546_p6 = por %p545_p5, %p544_p4 }
  0x10   :  { %p547_p7 = pnand %p546_p6, %p540_p3 }
  0x12   :  { %550 = shalt.err (!%p547_p7)
}
  0x13   :  { %s649_s13 = smov 128   ;;  %s650_s14 = smov 8  }
  0x14   :  { %39 = dma.hbm_to_vmem [thread:$0]  %s797_s1, 256, %s34_s25, [#allocation6], %s649_s13, %s649_s13, %s650_s14  }
  0x15   :  { %s551_s19 = scalar_lea.hbm %s796_s0, 256 }
  0x16   :  { %p552_p8 = scmp.ne.s32.totalorder %s796_s0, %s551_s19  ;;  %p555_p9 = scmp.lt.u32.totalorder %s551_s19, %s796_s0 }
  0x18   :  { %p557_p10 = pnand %p555_p9, %p552_p8 }
  0x1a   :  { %560 = shalt.err (!%p557_p10)
}
  0x1b   :  { %s561_s24 = scalar_lea.vmem %s694_s27, 256  ;;  %p566_p12 = scmp.lt.s32.totalorder %s694_s27, %s694_s27 }
  0x1c   :  { %p562_p11 = scmp.ne.s32.totalorder %s694_s27, %s561_s24  ;;  %p567_p13 = scmp.lt.s32.totalorder %s561_s24, %s561_s24 }
  0x1e   :  { %p568_p0 = por %p567_p13, %p566_p12 }
  0x20   :  { %p569_p1 = pnand %p568_p0, %p562_p11 }
  0x22   :  { %572 = shalt.err (!%p569_p1)
}
  0x23   :  { %27 = dma.hbm_to_vmem [thread:$0]  %s796_s0, 256, %s694_s27, [#allocation3], %s649_s13, %s649_s13, %s650_s14  }
  0x24   :  { %s651_s26 = smov [#allocation7]   ;;  %s652_s29 = smov [#allocation8]  }
  0x25   :  { %s47_s28 = sshll.u32 %s651_s26, 4  ;;  %s61_s30 = sshll.u32 %s652_s29, 4  ;;  %s48_s28 = int_to_ptr.vmem [resolvable:$true] %s47_s28  ;;  %s731_s30 = int_to_ptr.vmem [resolvable:$true] %s61_s30 }
  0x26   :  { %s573_s10 = scalar_lea.hbm %s799_s3, 512 }
  0x27   :  { %p574_p2 = scmp.ne.s32.totalorder %s799_s3, %s573_s10  ;;  %p577_p3 = scmp.lt.u32.totalorder %s573_s10, %s799_s3 }
  0x29   :  { %p579_p4 = pnand %p577_p3, %p574_p2 }
  0x2b   :  { %582 = shalt.err (!%p579_p4)
}
  0x2c   :  { %s583_s0 = scalar_lea.vmem %s48_s28, 512  ;;  %p588_p6 = scmp.lt.s32.totalorder %s48_s28, %s48_s28 }
  0x2d   :  { %p584_p5 = scmp.ne.s32.totalorder %s48_s28, %s583_s0  ;;  %p589_p7 = scmp.lt.s32.totalorder %s583_s0, %s583_s0 }
  0x2f   :  { %p590_p8 = por %p589_p7, %p588_p6 }
  0x31   :  { %p591_p9 = pnand %p590_p8, %p584_p5 }
  0x33   :  { %594 = shalt.err (!%p591_p9)
}
  0x34   :  { %53 = dma.hbm_to_vmem [thread:$0]  %s799_s3, 512, %s48_s28, [#allocation6], %s649_s13, %s649_s13, %s650_s14  }
  0x35   :  { %s595_s20 = scalar_lea.hbm %s801_s5, 512 }
  0x36   :  { %p596_p10 = scmp.ne.s32.totalorder %s801_s5, %s595_s20  ;;  %p599_p11 = scmp.lt.u32.totalorder %s595_s20, %s801_s5 }
  0x38   :  { %p601_p12 = pnand %p599_p11, %p596_p10 }
  0x3a   :  { %604 = shalt.err (!%p601_p12)
}
  0x3b   :  { %s605_s1 = scalar_lea.vmem %s731_s30, 512  ;;  %p610_p0 = scmp.lt.s32.totalorder %s731_s30, %s731_s30 }
  0x3c   :  { %p606_p13 = scmp.ne.s32.totalorder %s731_s30, %s605_s1  ;;  %p611_p1 = scmp.lt.s32.totalorder %s605_s1, %s605_s1 }
  0x3e   :  { %p612_p2 = por %p611_p1, %p610_p0 }
  0x40   :  { %p613_p3 = pnand %p612_p2, %p606_p13 }
  0x42   :  { %616 = shalt.err (!%p613_p3)
}
  0x43   :  { %67 = dma.hbm_to_vmem [thread:$0]  %s801_s5, 512, %s731_s30, [#allocation9], %s649_s13, %s649_s13, %s650_s14  }
  0x44   :  { %639 = dma.done.wait [#allocation3], 256  }
  0x45   :  { %640 = vsyncadd [#allocation3], 4294967040 }
  0x46   :  { %641 = dma.done.wait [#allocation6], 768  }
  0x47   :  { %642 = vsyncadd [#allocation6], 4294966528 }
  0x48   :  { %643 = dma.done.wait [#allocation9], 512  }
  0x49   :  { %644 = vsyncadd [#allocation9], 4294966784  ;;  %vm93_vm0 = vcmask 130048   ;;  %v84_v0 = vld [vmem:[#allocation5] sm:$0xff]  ;;  %v85_v1 = vld [vmem:[#allocation5 + $0x8] sm:$0xff]  ;;  %vm188_vm1 = vcmask 261120   ;;  %v402_v52 = vlaneseq }
  0x4a   :  { %v82_v2 = vld [vmem:[#allocation2] sm:$0xff]  ;;  %v482_v3 = vpack.c.bf16 %v85_v1, %v84_v0  ;;  %v83_v4 = vld [vmem:[#allocation2 + $0x8] sm:$0xff]  ;;  %v179_v7 = vld [vmem:[#allocation7 + $0x10] sm:$0xff] }
  0x4b   :  { %457 = vmatprep.mubr.msk.f32.mxu0 %vm93_vm0, %v82_v2  ;;  %v177_v5 = vld [vmem:[#allocation7] sm:$0xff]  ;;  %v178_v6 = vld [vmem:[#allocation7 + $0x8] sm:$0xff]  ;;  %v180_v9 = vld [vmem:[#allocation7 + $0x18] sm:$0xff]  ;;  %v403_v62 = vand.u32 127, %v402_v52 }
  0x4c   :  { %483 = vmatprep.subr.bf16.mxu0 %v482_v3  ;;  %v486_v8 = vpack.c.bf16 %v178_v6, %v177_v5  ;;  %v490_v10 = vpack.c.bf16 %v180_v9, %v179_v7  ;;  %v428_v11 = vld [vmem:[%s798_s2] ss:$0 sm:$0xff]  ;;  %v273_v19 = vld [vmem:[#allocation8 + $0x8] sm:$0xff]  ;;  %v274_v20 = vld [vmem:[#allocation8 + $0x10] sm:$0xff] }
  0x4d   :  { %485 = vmatpush3.bf16.msra.mxu0 %v482_v3  ;;  %v272_v18 = vld [vmem:[#allocation8] sm:$0xff]  ;;  %v275_v22 = vld [vmem:[#allocation8 + $0x18] sm:$0xff]  ;;  %vm404_vm4 = vcmp.lt.s32.totalorder %v403_v62, 4 }
  0x4e   :  { %487 = vmatprep.subr.bf16.mxu1 %v486_v8  ;;  %v494_v21 = vpack.c.bf16 %v273_v19, %v272_v18  ;;  %v498_v23 = vpack.c.bf16 %v275_v22, %v274_v20  ;;  %v431_v24 = vld [vmem:[%s800_s4] ss:$0 sm:$0xff]  ;;  %s653_s4 = smov [#allocation10]  }
  0x4f   :  { %489 = vmatpush3.bf16.msra.mxu1 %v486_v8  ;;  %v434_v31 = vld [vmem:[%s802_s6] ss:$0 sm:$0xff]  ;;  %s414_s6 = sshll.u32 %s653_s4, 4  ;;  %s415_s6 = int_to_ptr.vmem [resolvable:$true] %s414_s6 }
  0x50   :  { %458 = vmatmul.mubr.msk.f32.vlgmr.msra.gmra.mrb[0].mxu0 %vm93_vm0, %v83_v4  ;;  %491 = vmatprep.subr.bf16.mxu1 %v490_v10  ;;  %s617_s8 = scalar_lea.vmem %s415_s6, 256  ;;  %p622_p5 = scmp.lt.s32.totalorder %s415_s6, %s415_s6 }
  0x51   :  { %495 = vmatprep.subr.bf16.mxu0 %v494_v21  ;;  %p618_p4 = scmp.ne.s32.totalorder %s415_s6, %s617_s8  ;;  %p623_p6 = scmp.lt.s32.totalorder %s617_s8, %s617_s8 }
  0x52   :  { %497 = vmatpush3.bf16.msra.mxu0 %v494_v21 }
  0x53   :  { %493 = vmatpush3.bf16.msra.mxu1 %v490_v10  ;;  %499 = vmatprep.subr.bf16.mxu0 %v498_v23  ;;  %p624_p7 = por %p623_p6, %p622_p5 }
  0x55   :  { %p625_p8 = pnand %p624_p7, %p618_p4 }
  0x56   :  { %501 = vmatpush3.bf16.msra.mxu0 %v498_v23 }
 0x123   :  { %v459_v12 = vpop.f32.mrb[0].mxu0 }
 0x124   :  { %v172_v13 = vadd.f32 %v459_v12, %v428_v11  ;;  %v166_v14 = vpop.f32.mrb[1].mxu0 }
 0x125   :  { %v167_v15 = vadd.f32 %v428_v11, %v166_v14 }
 0x127   :  { %509 = vtanh.f32 %v167_v15 }
 0x128   :  { %511 = vtanh.f32 %v172_v13 }
 0x131   :  { %v510_v16 = vpop.eup %509 }
 0x132   :  { %v512_v17 = vpop.eup %511  ;;  %468 = vmatprep.mubr.msk.f32.mxu1 %vm188_vm1, %v510_v16 }
 0x133   :  { %469 = vmatmul.mubr.msk.f32.vlgmr.msra.gmra.mrb[0].mxu1 %vm188_vm1, %v512_v17 }
 0x206   :  { %v470_v25 = vpop.f32.mrb[0].mxu1 }
 0x207   :  { %v267_v26 = vadd.f32 %v470_v25, %v431_v24  ;;  %v261_v27 = vpop.f32.mrb[1].mxu1 }
 0x208   :  { %v262_v28 = vadd.f32 %v431_v24, %v261_v27 }
 0x20a   :  { %513 = vtanh.f32 %v262_v28 }
 0x20b   :  { %515 = vtanh.f32 %v267_v26 }
 0x214   :  { %v514_v29 = vpop.eup %513 }
 0x215   :  { %v516_v30 = vpop.eup %515  ;;  %479 = vmatprep.mubr.msk.f32.mxu0 %vm188_vm1, %v514_v29 }
 0x216   :  { %480 = vmatmul.mubr.msk.f32.vlgmr.msra.gmra.mrb[2].mxu0 %vm188_vm1, %v516_v30 }
 0x2e9   :  { %v481_v32 = vpop.f32.mrb[2].mxu0 }
 0x2ea   :  { %v361_v33 = vadd.f32 %v481_v32, %v434_v31  ;;  %v355_v34 = vpop.f32.mrb[3].mxu0 }
 0x2eb   :  { %v356_v35 = vadd.f32 %v434_v31, %v355_v34 }
 0x2ec   :  { %v371_v36 = vand.u32 2147483647, %v361_v33  ;;  %v369_v57 = vmax.f32 %v361_v33, 0.0 }
 0x2ed   :  { %v370_v37 = vand.u32 2147483647, %v356_v35  ;;  %v368_v61 = vmax.f32 %v356_v35, 0.0 }
 0x2ee   :  { %v373_v38 = vsub.f32 0.0, %v371_v36 }
 0x2ef   :  { %v372_v39 = vsub.f32 0.0, %v370_v37 }
 0x2f0   :  { %v376_v40 = vmul.f32 1.442695, %v373_v38 }
 0x2f1   :  { %v374_v41 = vmul.f32 1.442695, %v372_v39 }
 0x2f2   :  { %517 = vpow2.f32 %v376_v40 }
 0x2f3   :  { %519 = vpow2.f32 %v374_v41 }
 0x2fc   :  { %v518_v42 = vpop.eup %517 }
 0x2fd   :  { %v520_v43 = vpop.eup %519  ;;  %v387_v44 = vadd.f32 1.0, %v518_v42  ;;  %v390_v46 = vmul.f32 -0.5, %v518_v42  ;;  %v393_v49 = vand.u32 2147483647, %v518_v42 }
 0x2fe   :  { %v378_v45 = vadd.f32 1.0, %v520_v43  ;;  %v381_v47 = vmul.f32 -0.5, %v520_v43  ;;  %v384_v51 = vand.u32 2147483647, %v520_v43 }
 0x2ff   :  { %521 = vlog2.f32 %v387_v44  ;;  %v391_v48 = vadd.f32 1.0, %v390_v46  ;;  %vm394_vm2 = vcmp.lt.f32.partialorder %v393_v49, 0.0004427343 }
 0x300   :  { %523 = vlog2.f32 %v378_v45  ;;  %v382_v50 = vadd.f32 1.0, %v381_v47  ;;  %vm385_vm3 = vcmp.lt.f32.partialorder %v384_v51, 0.0004427343 }
 0x301   :  { %525 = vtanh.f32 %v361_v33  ;;  %v392_v56 = vmul.f32 %v518_v42, %v391_v48 }
 0x302   :  { %527 = vtanh.f32 %v356_v35  ;;  %v383_v59 = vmul.f32 %v520_v43, %v382_v50 }
 0x309   :  { %v522_v53 = vpop.eup %521 }
 0x30a   :  { %v524_v54 = vpop.eup %523  ;;  %v389_v55 = vmul.f32 0.6931472, %v522_v53 }
 0x30b   :  { %v380_v58 = vmul.f32 0.6931472, %v524_v54  ;;  %v526_v1 = vpop.eup %525 }
 0x30c   :  { %v395_v60 = vsel %vm394_vm2, %v392_v56, %v389_v55  ;;  %v528_v3 = vpop.eup %527  ;;  %v367_v6 = vmul.f32 2.0, %v526_v1 }
 0x30d   :  { %v397_v63 = vadd.f32 %v395_v60, %v369_v57  ;;  %v386_v0 = vsel %vm385_vm3, %v383_v59, %v380_v58  ;;  %v366_v8 = vmul.f32 2.0, %v528_v3 }
 0x30e   :  { %v396_v2 = vadd.f32 %v386_v0, %v368_v61 }
 0x30f   :  { %v399_v4 = vmax.f32 %v397_v63, 0.001 }
 0x310   :  { %v398_v5 = vmax.f32 %v396_v2, 0.001 }
 0x311   :  { %v401_v7 = vmin.f32 %v399_v4, 5.0 }
 0x312   :  { %v400_v9 = vmin.f32 %v398_v5, 5.0 }
 0x313   :  { %v406_v10 = vsel %vm404_vm4, %v367_v6, %v401_v7 }
 0x314   :  { %v405_v11 = vsel %vm404_vm4, %v366_v8, %v400_v9  ;;  %408 = vst [vmem:[#allocation10 + $0x8] sm:$0xff] %v406_v10 }
 0x315   :  { %407 = vst [vmem:[#allocation10] sm:$0xff] %v405_v11 }
 0x316   :  { %628 = shalt.err (!%p625_p8)
}
 0x317   :  { %s629_s11 = scalar_lea.hbm %s803_s7, 256 }
 0x318   :  { %p630_p9 = scmp.ne.s32.totalorder %s803_s7, %s629_s11  ;;  %p633_p10 = scmp.lt.u32.totalorder %s629_s11, %s803_s7 }
 0x31a   :  { %p635_p11 = pnand %p633_p10, %p630_p9 }
 0x31c   :  { %638 = shalt.err (!%p635_p11)
}
 0x31d   :  { %420 = dma.vmem_to_hbm [thread:$0]  %s415_s6, 256, %s803_s7, [#allocation4], %s649_s13, %s649_s13, %s650_s14  }
 0x31e   :  { %645 = dma.done.wait [#allocation4], 256  }
 0x31f   :  { %646 = vsyncadd [#allocation4], 4294967040 }
 0x320   :  { %424 = vsyncpa [#allocation3], 1 }
 0x321   :  { %425 = vsyncpa [#allocation6], 1 }
 0x322   :  { %426 = vsyncpa [#allocation9], 1 }
 0x323   :  { %427 = vsyncpa [#allocation4], 1 }

</bundles_post_ra>
